<compile_context>
chip_gen: v7x
topology: tpu7x:2x2x1
jax: 0.10.0
libtpu: 0.0.40
codegen_flags: <defaults>
</compile_context>

<pallas_src>
import math

import jax
import jax.numpy as jnp
from jax import lax
from jax.experimental import pallas as pl
from jax.experimental.pallas import tpu as pltpu

_INV_SQRT2 = 1.0 / math.sqrt(2.0)


def _ffn_kernel(x_ref, w1_ref, b1_ref, w2_ref, b2_ref, o_ref):
    # x_ref: (TM, D)   w1_ref: (H, D)   b1_ref: (1, H)
    # w2_ref: (D, H)   b2_ref: (1, D)   o_ref: (TM, D)
    x = x_ref[...]
    # Linear1: x @ W1^T  (contract D = last dim of both operands; MXU handles the
    # transposed RHS directly, same dimension numbers as flash-attention's q@k^T).
    h = lax.dot_general(x, w1_ref[...], (((1,), (1,)), ((), ())),
                        preferred_element_type=jnp.float32)
    h = h + b1_ref[...].astype(jnp.float32)                 # bias once, in f32
    # exact (erf-based) GELU, matching torch.nn.functional.gelu default, in f32
    h = 0.5 * h * (1.0 + lax.erf(h * _INV_SQRT2))
    # Linear2: h @ W2^T (contract H)
    o = lax.dot_general(h.astype(w2_ref.dtype), w2_ref[...], (((1,), (1,)), ((), ())),
                        preferred_element_type=jnp.float32)
    o = o + b2_ref[...].astype(jnp.float32)
    o_ref[...] = o.astype(o_ref.dtype)


def _round_up(a, b):
    return pl.cdiv(a, b) * b


def feed_forward(x, w1, b1, w2, b2, *, tm=256, compute_dtype=None):
    """ViT FeedForward forward pass.

    x : (B, S, D)                activations (features last).
    w1: (H, D), b1: (H,)         torch-layout Linear(dim -> hidden_dim).
    w2: (D, H), b2: (D,)         torch-layout Linear(hidden_dim -> dim).
    tm: token-row tile. Sweep 256..1024 on v6e/v7x; 128..256 is the v5e sweet spot.
    compute_dtype: optional MXU input dtype (e.g. jnp.bfloat16 on v6e/v7x);
        accumulation, bias add and GELU always stay in float32.
    """
    B, S, D = x.shape
    H = w1.shape[0]
    assert w1.shape == (H, D) and w2.shape == (D, H)
    M = B * S
    out_dtype = x.dtype

    cdt = compute_dtype if compute_dtype is not None else x.dtype
    x2 = x.reshape(M, D).astype(cdt)
    w1c = w1.astype(cdt)
    w2c = w2.astype(cdt)
    b1_2 = b1.reshape(1, H).astype(jnp.float32)
    b2_2 = b2.reshape(1, D).astype(jnp.float32)

    # Row tiling: no divisibility requirement -- pad rows to a multiple of the tile.
    tm_eff = int(min(tm, _round_up(M, 8)))
    m_pad = int(_round_up(M, tm_eff))
    if m_pad != M:
        x2 = jnp.pad(x2, ((0, m_pad - M), (0, 0)))
    grid = (m_pad // tm_eff,)

    # VMEM budget: weights single-buffered, x/out tiles double-buffered, f32 hidden.
    cdt_size = jnp.dtype(cdt).itemsize
    out_size = jnp.dtype(out_dtype).itemsize
    est_vmem = (2 * D * H * cdt_size + (H + D) * 4          # resident weights + biases
                + 2 * tm_eff * D * (cdt_size + out_size)    # pipelined x / out tiles
                + 2 * tm_eff * H * 4                        # f32 hidden activations
                + (2 << 20))                                # slack
    vmem_limit = int(min(max(est_vmem, 32 * 2**20), 64 * 2**20))  # <= v7x physical VMEM

    cost = pl.CostEstimate(
        flops=4 * M * D * H,
        transcendentals=M * H,
        bytes_accessed=(M * D * (cdt_size + out_size)
                        + 2 * D * H * cdt_size + (H + D) * 4),
    )

    out = pl.pallas_call(
        _ffn_kernel,
        out_shape=jax.ShapeDtypeStruct((m_pad, D), out_dtype),
        grid_spec=pltpu.PrefetchScalarGridSpec(
            num_scalar_prefetch=0,
            grid=grid,
            in_specs=[
                # token-row tile (double-buffered by the pipeline)
                pl.BlockSpec((tm_eff, D), lambda i: (i, 0)),
                # weights / biases: whole array resident in VMEM, single buffer
                # (constant across the grid, so double-buffering would only waste VMEM).
                pl.BlockSpec(memory_space=pltpu.MemorySpace.VMEM),
                pl.BlockSpec(memory_space=pltpu.MemorySpace.VMEM),
                pl.BlockSpec(memory_space=pltpu.MemorySpace.VMEM),
                pl.BlockSpec(memory_space=pltpu.MemorySpace.VMEM),
            ],
            out_specs=pl.BlockSpec((tm_eff, D), lambda i: (i, 0)),
        ),
        compiler_params=pltpu.CompilerParams(
            dimension_semantics=("parallel",),   # megacore-shards token rows on v7x
            vmem_limit_bytes=vmem_limit,
        ),
        cost_estimate=cost,
    )(x2, w1c, b1_2, w2c, b2_2)

    if m_pad != M:
        out = out[:M]
    return out.reshape(B, S, D)
    # TODO(synk): for very large D*H on v7x (64 MiB VMEM) full-resident weights may
    # not fit even in bf16; an H-tiled grid axis (reduction last, "arbitrary", with a
    # VMEM accumulator) would be the next step for that regime.


def _reference(x, w1, b1, w2, b2):
    h = jnp.einsum("bsd,hd->bsh", x, w1) + b1
    h = 0.5 * h * (1.0 + lax.erf(h * _INV_SQRT2))
    return jnp.einsum("bsh,dh->bsd", h, w2) + b2


if __name__ == "__main__":
    B, S, D, H = 2, 8, 32, 64   # dim=32, hidden_dim=64

    key = jax.random.PRNGKey(0)
    kx, kw1, kb1, kw2, kb2 = jax.random.split(key, 5)

    x = jax.random.normal(kx, (B, S, D), dtype=jnp.float32)
    # deterministic "Kaiming-uniform-like" init (torch nn.Linear layout: (out, in))
    bound1 = 1.0 / math.sqrt(D)
    bound2 = 1.0 / math.sqrt(H)
    w1 = jax.random.uniform(kw1, (H, D), minval=-bound1, maxval=bound1, dtype=jnp.float32)
    b1 = jax.random.uniform(kb1, (H,),   minval=-bound1, maxval=bound1, dtype=jnp.float32)
    w2 = jax.random.uniform(kw2, (D, H), minval=-bound2, maxval=bound2, dtype=jnp.float32)
    b2 = jax.random.uniform(kb2, (D,),   minval=-bound2, maxval=bound2, dtype=jnp.float32)

    ref = _reference(x, w1, b1, w2, b2)

    # f32 path: exact numerics (matches torch default Linear + erf GELU)
    out = jax.block_until_ready(feed_forward(x, w1, b1, w2, b2))
    assert out.shape == (B, S, D)
    assert jnp.allclose(out, ref, atol=1e-5, rtol=1e-5)

    # bf16-MXU path (v6e/v7x recommendation): bf16 inputs, f32 accumulation
    out_bf16 = jax.block_until_ready(
        feed_forward(x, w1, b1, w2, b2, compute_dtype=jnp.bfloat16))
    assert jnp.allclose(out_bf16, ref, atol=5e-2, rtol=5e-2)

    # ragged row count (M = 15 tokens): exercises the pad + slice path
    xr = jax.random.normal(kx, (3, 5, D), dtype=jnp.float32)
    out_r = jax.block_until_ready(feed_forward(xr, w1, b1, w2, b2))
    assert jnp.allclose(out_r, _reference(xr, w1, b1, w2, b2), atol=1e-5, rtol=1e-5)

    # TODO(synk): the custom Linear's `add_noise=True` branch and FeedForward.backward
    # are not defined in the provided source; only the add_noise=False forward is implemented.
    print("KERNEL_OK")
</pallas_src>

<mosaic_0001>
module attributes {stable_mosaic.version = 11 : i64} {
  func.func @_ffn_kernel(%arg0: i32, %arg1: memref<16x32xf32, #tpu.memory_space<vmem>>, %arg2: memref<64x32xf32, #tpu.memory_space<vmem>>, %arg3: memref<1x64xf32, #tpu.memory_space<vmem>>, %arg4: memref<32x64xf32, #tpu.memory_space<vmem>>, %arg5: memref<1x32xf32, #tpu.memory_space<vmem>>, %arg6: memref<16x32xf32, #tpu.memory_space<vmem>>) attributes {dimension_semantics = [#tpu.dimension_semantics<parallel>], iteration_bounds = array<i64: 1>, scalar_prefetch = 0 : i64, scratch_operands = 0 : i64, tpu.core_type = #tpu.core_type<tc>, window_params = [{transform_indices = @transform_0, window_bounds = array<i64: 16, 32>}, {pipeline_mode = #tpu.pipeline_mode<synchronous>, transform_indices = @transform_1, window_bounds = array<i64: 64, 32>}, {pipeline_mode = #tpu.pipeline_mode<synchronous>, transform_indices = @transform_2, window_bounds = array<i64: 1, 64>}, {pipeline_mode = #tpu.pipeline_mode<synchronous>, transform_indices = @transform_3, window_bounds = array<i64: 32, 64>}, {pipeline_mode = #tpu.pipeline_mode<synchronous>, transform_indices = @transform_4, window_bounds = array<i64: 1, 32>}, {transform_indices = @transform_5, window_bounds = array<i64: 16, 32>}]} {
    %c0 = arith.constant 0 : index
    %c0_0 = arith.constant 0 : index
    %0 = vector.load %arg1[%c0, %c0_0] : memref<16x32xf32, #tpu.memory_space<vmem>>, vector<16x32xf32>
    %c0_1 = arith.constant 0 : index
    %c0_2 = arith.constant 0 : index
    %1 = vector.load %arg2[%c0_1, %c0_2] : memref<64x32xf32, #tpu.memory_space<vmem>>, vector<64x32xf32>
    %cst = arith.constant dense<0.000000e+00> : vector<16x64xf32>
    %2 = tpu.matmul %0, %1, %cst {dimension_numbers = #tpu.dot_dimension_numbers<[1], [1], [0], [0], [0, 0, 1, 0], [], []>} : vector<16x32xf32>, vector<64x32xf32>, vector<16x64xf32> -> vector<16x64xf32>
    %c0_3 = arith.constant 0 : index
    %c0_4 = arith.constant 0 : index
    %3 = vector.load %arg3[%c0_3, %c0_4] : memref<1x64xf32, #tpu.memory_space<vmem>>, vector<1x64xf32>
    %4 = vector.broadcast %3 : vector<1x64xf32> to vector<16x64xf32>
    %5 = arith.addf %2, %4 : vector<16x64xf32>
    %cst_5 = arith.constant 5.000000e-01 : f32
    %6 = vector.broadcast %cst_5 : f32 to vector<16x64xf32>
    %7 = arith.mulf %6, %5 : vector<16x64xf32>
    %cst_6 = arith.constant 0.707106769 : f32
    %8 = vector.broadcast %cst_6 : f32 to vector<16x64xf32>
    %9 = arith.mulf %5, %8 : vector<16x64xf32>
    %10 = math.erf %9 : vector<16x64xf32>
    %cst_7 = arith.constant 1.000000e+00 : f32
    %11 = vector.broadcast %cst_7 : f32 to vector<16x64xf32>
    %12 = arith.addf %11, %10 : vector<16x64xf32>
    %13 = arith.mulf %7, %12 : vector<16x64xf32>
    %c0_8 = arith.constant 0 : index
    %c0_9 = arith.constant 0 : index
    %14 = vector.load %arg4[%c0_8, %c0_9] : memref<32x64xf32, #tpu.memory_space<vmem>>, vector<32x64xf32>
    %cst_10 = arith.constant dense<0.000000e+00> : vector<16x32xf32>
    %15 = tpu.matmul %13, %14, %cst_10 {dimension_numbers = #tpu.dot_dimension_numbers<[1], [1], [0], [0], [0, 0, 1, 0], [], []>} : vector<16x64xf32>, vector<32x64xf32>, vector<16x32xf32> -> vector<16x32xf32>
    %c0_11 = arith.constant 0 : index
    %c0_12 = arith.constant 0 : index
    %16 = vector.load %arg5[%c0_11, %c0_12] : memref<1x32xf32, #tpu.memory_space<vmem>>, vector<1x32xf32>
    %17 = vector.broadcast %16 : vector<1x32xf32> to vector<16x32xf32>
    %18 = arith.addf %15, %17 : vector<16x32xf32>
    %c0_13 = arith.constant 0 : index
    %c0_14 = arith.constant 0 : index
    %19 = vector.load %arg6[%c0_13, %c0_14] : memref<16x32xf32, #tpu.memory_space<vmem>>, vector<16x32xf32>
    tpu.vector_store %arg6[%c0_13, %c0_14], %18 {strides = array<i32>} : memref<16x32xf32, #tpu.memory_space<vmem>>, vector<16x32xf32>,
    return
  }
  func.func @transform_0(%arg0: i32) -> (i32, i32) {
    %c0_i32 = arith.constant 0 : i32
    %c0_i32_0 = arith.constant 0 : i32
    return %arg0, %c0_i32 : i32, i32
  }
  func.func @transform_1(%arg0: i32) -> (i32, i32) {
    %c0_i32 = arith.constant 0 : i32
    %c0_i32_0 = arith.constant 0 : i32
    %c0_i32_1 = arith.constant 0 : i32
    return %c0_i32, %c0_i32_0 : i32, i32
  }
  func.func @transform_2(%arg0: i32) -> (i32, i32) {
    %c0_i32 = arith.constant 0 : i32
    %c0_i32_0 = arith.constant 0 : i32
    %c0_i32_1 = arith.constant 0 : i32
    return %c0_i32, %c0_i32_0 : i32, i32
  }
  func.func @transform_3(%arg0: i32) -> (i32, i32) {
    %c0_i32 = arith.constant 0 : i32
    %c0_i32_0 = arith.constant 0 : i32
    %c0_i32_1 = arith.constant 0 : i32
    return %c0_i32, %c0_i32_0 : i32, i32
  }
  func.func @transform_4(%arg0: i32) -> (i32, i32) {
    %c0_i32 = arith.constant 0 : i32
    %c0_i32_0 = arith.constant 0 : i32
    %c0_i32_1 = arith.constant 0 : i32
    return %c0_i32, %c0_i32_0 : i32, i32
  }
  func.func @transform_5(%arg0: i32) -> (i32, i32) {
    %c0_i32 = arith.constant 0 : i32
    %c0_i32_0 = arith.constant 0 : i32
    return %arg0, %c0_i32 : i32, i32
  }
}

</mosaic_0001>

<bundles_post_ra>
// kernel: tpu_custom_call.1
= control target key start
LH: loop header
LB: loop body
LE: loop exit
PB: predicated region body
PF: predicated region fallthrough
CT: control target
= control target key end

     0   :  { %vm38_vm0 = vcmask 261120   ;;  %s531_s0 = inlined_call_operand.vmem [shape: f32[16,32], index: 0, kind: input, shape index: {}]   ;;  %s532_s1 = inlined_call_operand.vmem [shape: f32[64,32], index: 1, kind: input, shape index: {}]   ;;  %s533_s2 = inlined_call_operand.vmem [shape: f32[1,64], index: 2, kind: input, shape index: {}]   ;;  %s534_s3 = inlined_call_operand.vmem [shape: f32[32,64], index: 3, kind: input, shape index: {}]   ;;  %s535_s4 = inlined_call_operand.vmem [shape: f32[1,32], index: 4, kind: input, shape index: {}]   ;;  %s536_s5 = inlined_call_operand.hbm [shape: f32[16,32], index: 5, kind: output, shape index: {}]  }
   0x1   :  { %v23_v0 = vld [vmem:[%s532_s1] sm:$0xff]  ;;  %v24_v1 = vld [vmem:[%s532_s1 + $0x8] sm:$0xff]  ;;  %v25_v2 = vld [vmem:[%s532_s1 + $0x10] sm:$0xff] }
   0x2   :  { %v341_v3 = vpack.c.bf16 %v24_v1, %v23_v0  ;;  %vm452_vm1 = vmpackc.low %vm38_vm0, %vm38_vm0  ;;  %v26_v5 = vld [vmem:[%s532_s1 + $0x18] sm:$0xff]  ;;  %v21_v7 = vld [vmem:[%s531_s0] sm:$0xff] }
   0x3   :  { %v347_v6 = vpack.c.bf16 %v26_v5, %v25_v2 }
   0x4   :  { %343 = vmatprep.subr.msk.bf16.mxu0 %vm452_vm1, %v341_v3 }
   0x5   :  { %10 = vsyncpa [#allocation3], 0  ;;  %346 = vmatpush3.bf16.xpose.msk.msra.mxu0 %vm452_vm1, %v341_v3  ;;  %327 = vmatprep.mubr.msk.f32.mxu0 %vm38_vm0, %v21_v7  ;;  %v27_v8 = vld [vmem:[%s532_s1 + $0x20] sm:$0xff]  ;;  %v28_v9 = vld [vmem:[%s532_s1 + $0x28] sm:$0xff]  ;;  %vm165_vm2 = vcmask 523264   ;;  %s408_s21 = smov [#allocation2]  }
   0x6   :  { %349 = vmatprep.subr.msk.bf16.mxu0 %vm452_vm1, %v347_v6  ;;  %v353_v10 = vpack.c.bf16 %v28_v9, %v27_v8  ;;  %v29_v11 = vld [vmem:[%s532_s1 + $0x30] sm:$0xff]  ;;  %v30_v12 = vld [vmem:[%s532_s1 + $0x38] sm:$0xff]  ;;  %v22_v14 = vld [vmem:[%s531_s0 + $0x8] sm:$0xff]  ;;  %s266_s22 = sshll.u32 %s408_s21, 4  ;;  %s267_s22 = int_to_ptr.vmem [resolvable:$true] %s266_s22 }
   0x7   :  { %v359_v13 = vpack.c.bf16 %v30_v12, %v29_v11  ;;  %v154_v15 = vld [vmem:[%s534_s3] sm:$0xff]  ;;  %v155_v16 = vld [vmem:[%s534_s3 + $0x8] sm:$0xff]  ;;  %vm366_vm3 = vmpackc.low %vm165_vm2, %vm165_vm2  ;;  %s384_s23 = scalar_lea.vmem %s267_s22, 256  ;;  %p389_p1 = scmp.lt.s32.totalorder %s267_s22, %s267_s22 }
   0x8   :  { %v365_v17 = vpack.c.bf16 %v155_v16, %v154_v15  ;;  %v156_v18 = vld [vmem:[%s534_s3 + $0x10] sm:$0xff]  ;;  %v157_v19 = vld [vmem:[%s534_s3 + $0x18] sm:$0xff]  ;;  %v277_v21 = vld [vmem:[%s533_s2] ss:$0 sm:$0xff]  ;;  %p385_p0 = scmp.ne.s32.totalorder %s267_s22, %s384_s23  ;;  %p390_p2 = scmp.lt.s32.totalorder %s384_s23, %s384_s23 }
   0x9   :  { %v371_v20 = vpack.c.bf16 %v157_v19, %v156_v18  ;;  %v288_v36 = vld [vmem:[%s535_s4] ss:$0 sm:$0xff] }
   0xa   :  { %367 = vmatprep.subr.msk.bf16.mxu1 %vm366_vm3, %v365_v17  ;;  %p391_p3 = por %p390_p2, %p389_p1 }
   0xb   :  { %370 = vmatpush3.bf16.xpose.msk.msra.mxu1 %vm366_vm3, %v365_v17 }
   0xc   :  { %373 = vmatprep.subr.msk.bf16.mxu1 %vm366_vm3, %v371_v20  ;;  %p392_p4 = pnand %p391_p3, %p385_p0 }
   0xd   :  { %352 = vmatpush3.bf16.xpose.msk.msra.mxu0 %vm452_vm1, %v347_v6 }
   0xe   :  { %355 = vmatprep.subr.msk.bf16.mxu0 %vm452_vm1, %v353_v10 }
  0x13   :  { %376 = vmatpush3.bf16.xpose.msk.msra.mxu1 %vm366_vm3, %v371_v20 }
  0x15   :  { %358 = vmatpush3.bf16.xpose.msk.msra.mxu0 %vm452_vm1, %v353_v10 }
  0x16   :  { %361 = vmatprep.subr.msk.bf16.mxu0 %vm452_vm1, %v359_v13 }
  0x1d   :  { %364 = vmatpush3.bf16.xpose.msk.msra.mxu0 %vm452_vm1, %v359_v13 }
  0x24   :  { %328 = vmatmul.mubr.msk.f32.vlgmr.msra.gmra.mrb[0].mxu0 %vm38_vm0, %v22_v14 }
  0xf7   :  { %v329_v22 = vpop.f32.mrb[0].mxu0 }
  0xf8   :  { %v141_v23 = vadd.f32 %v329_v22, %v277_v21  ;;  %v135_v24 = vpop.f32.mrb[1].mxu0 }
  0xf9   :  { %v136_v25 = vadd.f32 %v277_v21, %v135_v24 }
  0xfa   :  { %v147_v26 = vmul.f32 0.70710677, %v141_v23  ;;  %v145_v33 = vmul.f32 0.5, %v141_v23 }
  0xfb   :  { %v146_v27 = vmul.f32 0.70710677, %v136_v25  ;;  %v144_v31 = vmul.f32 0.5, %v136_v25 }
  0xfc   :  { %380 = verf.f32 %v147_v26 }
  0xfd   :  { %382 = verf.f32 %v146_v27 }
 0x106   :  { %v381_v28 = vpop.eup %380 }
 0x107   :  { %v383_v29 = vpop.eup %382  ;;  %v151_v30 = vadd.f32 1.0, %v381_v28 }
 0x108   :  { %v150_v32 = vadd.f32 1.0, %v383_v29 }
 0x109   :  { %v153_v35 = vmul.f32 %v151_v30, %v145_v33 }
 0x10a   :  { %v152_v34 = vmul.f32 %v150_v32, %v144_v31 }
 0x10c   :  { %338 = vmatprep.mubr.msk.f32.mxu1 %vm165_vm2, %v152_v34 }
 0x10d   :  { %339 = vmatmul.mubr.msk.f32.vlgmr.msra.gmra.mrb[0].mxu1 %vm165_vm2, %v153_v35 }
 0x1e0   :  { %v340_v37 = vpop.f32.mrb[0].mxu1 }
 0x1e1   :  { %v256_v38 = vadd.f32 %v340_v37, %v288_v36  ;;  %v250_v39 = vpop.f32.mrb[1].mxu1 }
 0x1e2   :  { %v251_v40 = vadd.f32 %v288_v36, %v250_v39 }
 0x1e3   :  { %260 = vst.msk [vmem:[#allocation2 + $0x8] sm:$0xff] %vm38_vm0, %v256_v38 }
 0x1e4   :  { %259 = vst.msk [vmem:[#allocation2] sm:$0xff] %vm38_vm0, %v251_v40 }
 0x1e5   :  { %395 = shalt.err (!%p392_p4)
}
 0x1e6   :  { %s396_s25 = scalar_lea.hbm %s536_s5, 256 }
 0x1e7   :  { %p397_p5 = scmp.ne.s32.totalorder %s536_s5, %s396_s25  ;;  %p400_p6 = scmp.lt.u32.totalorder %s396_s25, %s536_s5 }
 0x1e9   :  { %p402_p7 = pnand %p400_p6, %p397_p5 }
 0x1eb   :  { %405 = shalt.err (!%p402_p7)
}
 0x1ec   :  { %s409_s30 = smov 128   ;;  %s410_s6 = smov 8  }
 0x1ed   :  { %272 = dma.vmem_to_hbm [thread:$0]  %s267_s22, 256, %s536_s5, [#allocation3], %s409_s30, %s409_s30, %s410_s6  }
 0x1ee   :  { %406 = dma.done.wait [#allocation3], 256  }
 0x1ef   :  { %407 = vsyncadd [#allocation3], 4294967040 }
 0x1f0   :  { %276 = vsyncpa [#allocation3], 1 }

</bundles_post_ra>
